<compile_context>
chip_gen: v7x
topology: tpu7x:2x2x1
jax: 0.10.0
libtpu: 0.0.40
codegen_flags: <defaults>
</compile_context>

<pallas_src>
import functools

import jax
import jax.numpy as jnp
from jax.experimental import pallas as pl
from jax.experimental.pallas import tpu as pltpu


def _cels_kernel(logits_ref, targets_ref, out_ref, acc_ref, *,
                 epsilon, num_classes, n_valid, tile_n, tiles_per_split,
                 need_mask):
    """One batch tile: row-wise logsumexp + smoothed CE, accumulated per-row."""
    i = pl.program_id(1)  # inner (reduction) axis over batch tiles of this split

    @pl.when(i == 0)
    def _():
        acc_ref[...] = jnp.zeros_like(acc_ref)

    x = logits_ref[...].astype(jnp.float32)                  # (tn, C)
    tn, c = x.shape

    # Row-wise stats (lane reductions over the class axis, XLU).
    m = jnp.max(x, axis=1, keepdims=True)                    # (tn, 1)
    lse = jnp.log(jnp.sum(jnp.exp(x - m), axis=1, keepdims=True)) + m
    sum_x = jnp.sum(x, axis=1, keepdims=True)                # (tn, 1)

    # x[r, t_r] via iota-compare (torch's scatter_ one-hot fused with its reduce).
    # targets block is (tn, 1) int32 (lane-padded in VMEM); tile_n is capped so
    # this costs at most ~4 MiB of double-buffered VMEM.
    col_ids = jax.lax.broadcasted_iota(jnp.int32, (tn, c), 1)
    x_t = jnp.sum(jnp.where(col_ids == targets_ref[...], x, 0.0),
                  axis=1, keepdims=True)                     # (tn, 1)

    # Smoothed weights sum to 1, so:
    #   row_loss = lse - (1-eps)*x_t - (eps/C)*sum_x
    row_loss = lse - (1.0 - epsilon) * x_t - (epsilon / num_classes) * sum_x

    if need_mask:
        s = pl.program_id(0)
        row0 = (s * tiles_per_split + i) * tile_n
        row_ids = row0 + jax.lax.broadcasted_iota(jnp.int32, (tn, 1), 0)
        row_loss = jnp.where(row_ids < n_valid, row_loss, 0.0)

    acc_ref[...] += row_loss                                 # per-row VPU add only

    # Epilogue: single full reduce + lane-dense store of this core's partial sum.
    @pl.when(i == pl.num_programs(1) - 1)
    def _():
        total = jnp.sum(acc_ref[...])
        out_ref[...] = jnp.full(out_ref.shape, total, dtype=out_ref.dtype)


def cross_entropy_label_smooth(logits, targets, *, num_classes, epsilon,
                               splits=2, max_tile_n=4096,
                               logits_buffer_bytes=8 * 1024 * 1024):
    """logits: (N, C) float, targets: (N,) int -> scalar float32 loss."""
    n, c = logits.shape
    assert c == num_classes

    # Keep the leading core-split only when there is enough work per split.
    if n < splits * 8:
        splits = 1

    itemsize = jnp.dtype(logits.dtype).itemsize
    c_lanes = max(128, ((c + 127) // 128) * 128)          # lane-padded class width

    # Rows such that one logits block is ~logits_buffer_bytes (double-buffered by
    # the Pallas pipeline), capped so targets/acc lane padding stays small.
    rows_fit = max(8, (logits_buffer_bytes // (c_lanes * itemsize)) // 8 * 8)
    rows_per_split = (n + splits - 1) // splits
    tile_n = int(min(max_tile_n, rows_fit, ((rows_per_split + 7) // 8) * 8))
    tile_n = max(8, (tile_n // 8) * 8)
    tiles_per_split = (rows_per_split + tile_n - 1) // tile_n
    n_covered = splits * tiles_per_split * tile_n

    targets2d = targets.astype(jnp.int32).reshape(n, 1)

    kernel = functools.partial(
        _cels_kernel,
        epsilon=float(epsilon),
        num_classes=int(num_classes),
        n_valid=int(n),
        tile_n=int(tile_n),
        tiles_per_split=int(tiles_per_split),
        need_mask=(n_covered != n),
    )

    row_block_map = lambda s, i: (s * tiles_per_split + i, 0)

    partials = pl.pallas_call(
        kernel,
        out_shape=jax.ShapeDtypeStruct((splits, 8, 128), jnp.float32),
        grid_spec=pltpu.PrefetchScalarGridSpec(
            num_scalar_prefetch=0,
            grid=(splits, tiles_per_split),
            in_specs=[
                pl.BlockSpec((tile_n, c), row_block_map),   # logits tile
                pl.BlockSpec((tile_n, 1), row_block_map),   # targets tile
            ],
            # One lane-dense partial-sum block per core-split (resident across i).
            out_specs=pl.BlockSpec((1, 8, 128), lambda s, i: (s, 0, 0)),
            scratch_shapes=[pltpu.VMEM((tile_n, 1), jnp.float32)],
        ),
        compiler_params=pltpu.CompilerParams(
            # batch-split axis parallel (v7x megacore); tile axis is a reduction
            dimension_semantics=("parallel", "arbitrary"),
            vmem_limit_bytes=32 * 1024 * 1024,
        ),
    )(logits, targets2d)

    return jnp.sum(partials[:, 0, 0]) / n


def _reference(logits, targets, num_classes, epsilon):
    log_probs = jax.nn.log_softmax(logits.astype(jnp.float32), axis=1)
    onehot = jax.nn.one_hot(targets, num_classes, dtype=jnp.float32)
    smoothed = (1.0 - epsilon) * onehot + epsilon / num_classes
    return jnp.mean(jnp.sum(-smoothed * log_probs, axis=1))


if __name__ == "__main__":
    num_classes = 32
    epsilon = 0.1
    batch = 16

    key = jax.random.PRNGKey(0)
    k1, k2 = jax.random.split(key)
    logits = jax.random.normal(k1, (batch, num_classes), dtype=jnp.float32)
    targets = jax.random.randint(k2, (batch,), 0, num_classes, dtype=jnp.int32)

    loss = cross_entropy_label_smooth(
        logits, targets, num_classes=num_classes, epsilon=epsilon
    )
    loss = jax.block_until_ready(loss)

    ref = _reference(logits, targets, num_classes, epsilon)
    assert jnp.allclose(loss, ref, atol=1e-5, rtol=1e-4), (loss, ref)

    print("KERNEL_OK")
</pallas_src>

<mosaic_0001>
module attributes {stable_mosaic.version = 11 : i64} {
  func.func @_cels_kernel(%arg0: i32, %arg1: i32, %arg2: memref<8x32xf32, #tpu.memory_space<vmem>>, %arg3: memref<8x1xi32, #tpu.memory_space<vmem>>, %arg4: memref<1x8x128xf32, #tpu.memory_space<vmem>>, %arg5: memref<8x1xf32, #tpu.memory_space<vmem>>) attributes {dimension_semantics = [#tpu.dimension_semantics<parallel>, #tpu.dimension_semantics<arbitrary>], iteration_bounds = array<i64: 2, 1>, scalar_prefetch = 0 : i64, scratch_operands = 1 : i64, tpu.core_type = #tpu.core_type<tc>, window_params = [{transform_indices = @transform_0, window_bounds = array<i64: 8, 32>}, {transform_indices = @transform_1, window_bounds = array<i64: 8, 1>}, {transform_indices = @transform_2, window_bounds = array<i64: 1, 8, 128>}]} {
    %c0_i32 = arith.constant 0 : i32
    %0 = arith.cmpi eq, %arg1, %c0_i32 : i32
    %1 = arith.extui %0 : i1 to i32
    %c0_i32_0 = arith.constant 0 : i32
    %2 = arith.cmpi ne, %1, %c0_i32_0 : i32
    scf.if %2 {
      %cst_16 = arith.constant 0.000000e+00 : f32
      %35 = vector.broadcast %cst_16 : f32 to vector<8x1xf32>
      %c0_17 = arith.constant 0 : index
      %c0_18 = arith.constant 0 : index
      %36 = vector.load %arg5[%c0_17, %c0_18] : memref<8x1xf32, #tpu.memory_space<vmem>>, vector<8x1xf32>
      tpu.vector_store %arg5[%c0_17, %c0_18], %35 {strides = array<i32>} : memref<8x1xf32, #tpu.memory_space<vmem>>, vector<8x1xf32>,
    } else {
    }
    %c0 = arith.constant 0 : index
    %c0_1 = arith.constant 0 : index
    %3 = vector.load %arg2[%c0, %c0_1] : memref<8x32xf32, #tpu.memory_space<vmem>>, vector<8x32xf32>
    %cst = arith.constant dense<0xFF800000> : vector<8xf32>
    %4 = vector.multi_reduction <maximumf>, %3, %cst [1] : vector<8x32xf32> to vector<8xf32>
    %5 = vector.shape_cast %4 : vector<8xf32> to vector<8x1xf32>
    %6 = vector.broadcast %5 : vector<8x1xf32> to vector<8x32xf32>
    %7 = arith.subf %3, %6 : vector<8x32xf32>
    %8 = math.exp %7 : vector<8x32xf32>
    %cst_2 = arith.constant dense<0.000000e+00> : vector<8xf32>
    %9 = vector.multi_reduction <add>, %8, %cst_2 [1] : vector<8x32xf32> to vector<8xf32>
    %10 = vector.shape_cast %9 : vector<8xf32> to vector<8x1xf32>
    %11 = math.log %10 : vector<8x1xf32>
    %12 = arith.addf %11, %5 : vector<8x1xf32>
    %cst_3 = arith.constant dense<0.000000e+00> : vector<8xf32>
    %13 = vector.multi_reduction <add>, %3, %cst_3 [1] : vector<8x32xf32> to vector<8xf32>
    %14 = vector.shape_cast %13 : vector<8xf32> to vector<8x1xf32>
    %15 = tpu.iota {dimensions = array<i32: 1>} : vector<8x32xi32>
    %c0_4 = arith.constant 0 : index
    %c0_5 = arith.constant 0 : index
    %16 = vector.load %arg3[%c0_4, %c0_5] : memref<8x1xi32, #tpu.memory_space<vmem>>, vector<8x1xi32>
    %17 = vector.broadcast %16 : vector<8x1xi32> to vector<8x32xi32>
    %18 = arith.cmpi eq, %15, %17 : vector<8x32xi32>
    %cst_6 = arith.constant 0.000000e+00 : f32
    %19 = vector.broadcast %cst_6 : f32 to vector<8x32xf32>
    %20 = arith.select %18, %3, %19 : vector<8x32xi1>, vector<8x32xf32>
    %cst_7 = arith.constant dense<0.000000e+00> : vector<8xf32>
    %21 = vector.multi_reduction <add>, %20, %cst_7 [1] : vector<8x32xf32> to vector<8xf32>
    %22 = vector.shape_cast %21 : vector<8xf32> to vector<8x1xf32>
    %cst_8 = arith.constant 0.899999976 : f32
    %23 = vector.broadcast %cst_8 : f32 to vector<8x1xf32>
    %24 = arith.mulf %23, %22 : vector<8x1xf32>
    %25 = arith.subf %12, %24 : vector<8x1xf32>
    %cst_9 = arith.constant 3.125000e-03 : f32
    %26 = vector.broadcast %cst_9 : f32 to vector<8x1xf32>
    %27 = arith.mulf %26, %14 : vector<8x1xf32>
    %28 = arith.subf %25, %27 : vector<8x1xf32>
    %c0_10 = arith.constant 0 : index
    %c0_11 = arith.constant 0 : index
    %29 = vector.load %arg5[%c0_10, %c0_11] : memref<8x1xf32, #tpu.memory_space<vmem>>, vector<8x1xf32>
    %30 = arith.addf %29, %28 : vector<8x1xf32>
    %c0_12 = arith.constant 0 : index
    %c0_13 = arith.constant 0 : index
    %31 = vector.load %arg5[%c0_12, %c0_13] : memref<8x1xf32, #tpu.memory_space<vmem>>, vector<8x1xf32>
    tpu.vector_store %arg5[%c0_12, %c0_13], %30 {strides = array<i32>} : memref<8x1xf32, #tpu.memory_space<vmem>>, vector<8x1xf32>,
    %c0_i32_14 = arith.constant 0 : i32
    %32 = arith.cmpi eq, %arg1, %c0_i32_14 : i32
    %33 = arith.extui %32 : i1 to i32
    %c0_i32_15 = arith.constant 0 : i32
    %34 = arith.cmpi ne, %33, %c0_i32_15 : i32
    scf.if %34 {
      %c0_16 = arith.constant 0 : index
      %c0_17 = arith.constant 0 : index
      %35 = vector.load %arg5[%c0_16, %c0_17] : memref<8x1xf32, #tpu.memory_space<vmem>>, vector<8x1xf32>
      %36 = vector.shape_cast %35 : vector<8x1xf32> to vector<1x8x1xf32>
      %cst_18 = arith.constant dense<0.000000e+00> : vector<1xf32>
      %37 = vector.multi_reduction <add>, %36, %cst_18 [1, 2] : vector<1x8x1xf32> to vector<1xf32>
      %38 = vector.shape_cast %37 : vector<1xf32> to vector<1x1x1xf32>
      %39 = vector.extract %38[0, 0, 0] : f32 from vector<1x1x1xf32>
      %40 = vector.broadcast %39 : f32 to vector<1x8x128xf32>
      %c0_19 = arith.constant 0 : index
      %c0_20 = arith.constant 0 : index
      %c0_21 = arith.constant 0 : index
      %41 = vector.load %arg4[%c0_19, %c0_20, %c0_21] : memref<1x8x128xf32, #tpu.memory_space<vmem>>, vector<1x8x128xf32>
      tpu.vector_store %arg4[%c0_19, %c0_20, %c0_21], %40 {strides = array<i32>} : memref<1x8x128xf32, #tpu.memory_space<vmem>>, vector<1x8x128xf32>,
    } else {
    }
    return
  }
  func.func @transform_0(%arg0: i32, %arg1: i32) -> (i32, i32) {
    %c1_i32 = arith.constant 1 : i32
    %0 = arith.muli %arg0, %c1_i32 : i32
    %1 = arith.addi %0, %arg1 : i32
    %c0_i32 = arith.constant 0 : i32
    %c0_i32_0 = arith.constant 0 : i32
    return %1, %c0_i32 : i32, i32
  }
  func.func @transform_1(%arg0: i32, %arg1: i32) -> (i32, i32) {
    %c1_i32 = arith.constant 1 : i32
    %0 = arith.muli %arg0, %c1_i32 : i32
    %1 = arith.addi %0, %arg1 : i32
    %c0_i32 = arith.constant 0 : i32
    %c0_i32_0 = arith.constant 0 : i32
    return %1, %c0_i32 : i32, i32
  }
  func.func @transform_2(%arg0: i32, %arg1: i32) -> (i32, i32, i32) {
    %c0_i32 = arith.constant 0 : i32
    %c0_i32_0 = arith.constant 0 : i32
    %c0_i32_1 = arith.constant 0 : i32
    return %arg0, %c0_i32, %c0_i32_0 : i32, i32, i32
  }
}

</mosaic_0001>

<bundles_post_ra>
// kernel: tpu_custom_call.1
= control target key start
LH: loop header
LB: loop body
LE: loop exit
PB: predicated region body
PF: predicated region fallthrough
CT: control target
= control target key end

     0   :  { %7 = vsyncpa [#allocation4], 0  ;;  %s629_s0 = inlined_call_operand.vmem [shape: f32[16,32], index: 0, kind: input, shape index: {}]   ;;  %s630_s1 = inlined_call_operand.vmem [shape: s32[16,1], index: 1, kind: input, shape index: {}]   ;;  %s631_s2 = inlined_call_operand.hbm [shape: f32[2,8,128], index: 2, kind: output, shape index: {}]  }
   0x1   :  { %9 = vsyncpa [#allocation4 + $0x1], 0  ;;  %s507_s9 = smov 0   ;;  %s509_s10 = smov 0  }
   0x2   :  { %s511_s11 = smov 0   ;;  %s513_s12 = smov 0  }
   0x3   :  { %s515_s13 = smov 0   ;;  %s517_s14 = smov 0  }
   0x4 LB: > { %s333_s15 = sadd.s32 4294967295, %s487_s14   ;;  %s334_s16 = sadd.s32 4294967294, %s487_s14   ;;  %s487_s14 = sphi %s517_s14, %s15_s14   ;;  %s483_s13 = sphi %s515_s13, %s638_s13   ;;  %s479_s12 = sphi %s513_s12, %s637_s12   ;;  %s475_s11 = sphi %s511_s11, %s636_s11   ;;  %s471_s10 = sphi %s509_s10, %s635_s10   ;;  %s467_s9 = sphi %s507_s9, %s634_s9  }
   0x5   : > { %s27_s17 = sadd.s32 1, %s483_s13  ;;  %s90_s18 = sadd.s32 1, %s475_s11 }
   0x6   : > { %p29_p0 = scmp.ge.s32.totalorder %s27_s17, 2  ;;  %p100_p1 = scmp.ne.s32.totalorder %s475_s11, %s471_s10 }
   0x7   : > { %p101_p2 = scmp.eq.s32.totalorder %s333_s15, 1  ;;  %p106_p3 = scmp.ne.s32.totalorder %s471_s10, %s467_s9 }
   0x8   : > { %s640_s17 = smov (%p29_p0, %s27_s17), 0  ;;  %p107_p5 = scmp.eq.s32.totalorder %s334_s16, 1 }
   0x9   : > { %p547_p4 = por %p101_p2, %p100_p1  ;;  %s87_s20 = ssub.s32 %s483_s13, %s640_s17 }
   0xa   : > { %p337_p6 = scmp.ge.s32.totalorder %s487_s14, 1  ;;  %p88_p7 = scmp.eq.s32.totalorder %s87_s20, 0 }
   0xb   : > { %p554_p8 = por %p107_p5, %p106_p3  ;;  %p143_p9 = scmp.lt.s32.totalorder %s487_s14, 3 }
   0xc   : > { %s560_s22 = scalar_select %p88_p7, %s475_s11, %s90_s18  }
   0xd   : > { %p144_p10 = pnand %p337_p6, %p143_p9 }
   0xe   : > { %p171_p11 = scmp.lt.s32.totalorder (!%p144_p10), %s479_s12, 1  ;;  %v489_v0 = vmov (!%p144_p10), 0   ;;  %vm189_vm0 = vcmask (!%p144_p10), 261120   ;;  %v205_v7 = vlaneseq (!%p144_p10)  ;;  %vm186_vm2 = vcmask (!%p144_p10), 7168   ;;  %s167_s3 = sand.u32 (!%p144_p10), 1, %s471_s10  }
   0xf   : > { %147 = sbr.rel (%p144_p10) target bundleno = 577 (0x241), region = 28  ;;  %404 = vset.pattern.permute.xlu0 (!%p144_p10), %v489_v0  ;;  %v490_v15 = vmov (!%p144_p10), 0.0   ;;  %s338_s4 = sshll.u32 (!%p144_p10), %s167_s3, 3 }
  0x10   : > { %v206_v8 = vand.u32 (!%p144_p10), 127, %v205_v7  ;;  %187 = vst.msk [vmem:[#allocation2] sm:$0xff] (!%p144_p10), %vm186_vm2, %v490_v15  ;;  %s169_s5 = scalar_lea.vmem (!%p144_p10), [#allocation3], %s338_s4  ;;  %s342_s7 = sshll.u32 (!%p144_p10), %s479_s12, 7 }
  0x11   : > { %s254_s6 = sshll.u32 (!%p144_p10), %s169_s5, 4  ;;  %s584_s18 = scalar_lea.hbm (!%p144_p10), %s631_s2, %s342_s7  ;;  %s579_s6 = int_to_ptr.vmem [resolvable:$true] %s254_s6 }
  0x12   : > { %s241_s20 = scalar_lea.sflag (!%p144_p10), [#allocation4], %s167_s3 }
  0x16   : > { %s172_s23 = scalar_select %p171_p11, %s479_s12, 1 }
  0x17   : > { %v220_v25 = vld [vmem:[#allocation2] sm:$0xff]  ;;  %s491_s12 = smov [#allocation3]  }
  0x18   : > { %s339_s24 = sshll.u32 %s172_s23, 3  ;;  %s409_s23 = scalar_lea.vmem %s579_s6, 128 }
  0x19   : > { %s174_s27 = scalar_lea.vmem %s629_s0, %s339_s24  ;;  %s180_s30 = scalar_lea.vmem %s630_s1, %s339_s24 }
  0x1a   : > { %v188_v1 = vld [vmem:[%s174_s27] sm:$0xff]  ;;  %p410_p12 = scmp.ne.s32.totalorder %s579_s6, %s409_s23  ;;  %s413_s24 = sshll.u32 %s491_s12, 4  ;;  %s414_s24 = int_to_ptr.vmem [resolvable:$false] %s413_s24 }
  0x1b   : > { %v190_v2 = vsel %vm189_vm0, %v188_v1, -inf  ;;  %v207_v3 = vld [vmem:[%s180_s30] sm:$0xff]  ;;  %v202_v14 = vsel %vm189_vm0, %v188_v1, 0.0  ;;  %s415_s25 = scalar_lea.vmem %s414_s24, 256  ;;  %p416_p1 = scmp.lt.s32.totalorder %s579_s6, %s414_s24 }
  0x1c   : > { %191 = vmax.xlane.f32.xlu0 %v190_v2  ;;  %p411_p13 = pnand %p410_p12, %p547_p4  ;;  %p417_p2 = scmp.lt.s32.totalorder %s415_s25, %s409_s23 }
  0x1e   : > { %p412_p0 = pneg %p411_p13  ;;  %p418_p3 = por %p417_p2, %p416_p1 }
  0x20   : > { %p419_p5 = pnand %p418_p3, %p412_p0 }
  0x32   : > { %209 = vperm.xlu0 %404, %v207_v3  }
  0xa9   : > { %v192_v4 = vpop.xlane.xlu0 %191 }
  0xaa   : > { %v193_v5 = vsub.f32 %v188_v1, %v192_v4 }
  0xac   : > { %v194_v6 = vmul.f32 1.442695, %v193_v5 }
  0xae   : > { %405 = vpow2.f32 %v194_v6 }
  0xb1   : > { %v210_v9 = vpop.permute.xlu0 %209 }
  0xb2   : > { %vm211_vm1 = vcmp.eq.s32.totalorder %v206_v8, %v210_v9 }
  0xb3   : > { %v212_v11 = vsel %vm211_vm1, %v188_v1, 0.0 }
  0xb4   : > { %v213_v13 = vsel %vm189_vm0, %v212_v11, 0.0 }
  0xb8   : > { %v406_v10 = vpop.eup %405 }
  0xb9   : > { %v196_v12 = vsel %vm189_vm0, %v406_v10, 0.0 }
  0xba   : > { %197 = vadd.xlane.f32.xlu1 %v196_v12 }
  0xbe   : > { %214 = vadd.xlane.f32.xlu1 %v213_v13 }
  0xc2   : > { %203 = vadd.xlane.f32.xlu1 %v202_v14 }
 0x147   : > { %v198_v16 = vpop.xlane.xlu1 %197 }
 0x148   : > { %407 = vlog2.f32 %v198_v16 }
 0x14b   : > { %v215_v17 = vpop.xlane.xlu1 %214 }
 0x14c   : > { %v216_v22 = vmul.f32 0.9, %v215_v17 }
 0x14f   : > { %v204_v19 = vpop.xlane.xlu1 %203 }
 0x150   : > { %v218_v23 = vmul.f32 0.003125, %v204_v19 }
 0x152   : > { %v408_v18 = vpop.eup %407 }
 0x153   : > { %v200_v20 = vmul.f32 0.6931472, %v408_v18 }
 0x155   : > { %v201_v21 = vadd.f32 %v200_v20, %v192_v4 }
 0x157   : > { %v217_v24 = vsub.f32 %v201_v21, %v216_v22 }
 0x159   : > { %v219_v26 = vsub.f32 %v217_v24, %v218_v23 }
 0x15b   : > { %v221_v27 = vadd.f32 %v220_v25, %v219_v26 }
 0x15d   : > { %223 = vst.msk [vmem:[#allocation2] sm:$0xff] %vm186_vm2, %v221_v27 }
 0x164   : > { %v227_v28 = vld [vmem:[#allocation2] sm:$0xff] }
 0x165   : > { %v228_v29 = vsel %vm186_vm2, %v227_v28, 0.0 }
 0x166   : > { %229 = vadd.xlane.f32.xlu1 %v228_v29 }
 0x1f3   : > { %v230_v30 = vpop.xlane.xlu1 %229 }
 0x1f4   : > { %v231_v31 = vrot.slane %v230_v30, 4 }
 0x1f6   : > { %v232_v32 = vadd.f32 %v231_v31, %v230_v30 }
 0x1f8   : > { %v233_v33 = vrot.slane %v232_v32, 2 }
 0x1fa   : > { %v234_v34 = vadd.f32 %v233_v33, %v232_v32 }
 0x1fc   : > { %v235_v35 = vrot.slane %v234_v34, 1 }
 0x1fe   : > { %v236_v36 = vadd.f32 %v235_v35, %v234_v34 }
 0x200   : > { %345 = vpush %v236_v36 }
 0x231   : > { %s346_s8 = spop %345 }
 0x232   : > { %v238_v37 = vstv %s346_s8 }
 0x233   : > { %239 = vst [vmem:[%s169_s5] sm:$0xff] %v238_v37 }
 0x234   : > { %422 = shalt.err (!%p419_p5)
}
 0x235   : > { %s423_s26 = scalar_lea.hbm %s584_s18, 128  ;;  %s427_s29 = scalar_lea.hbm %s631_s2, 256 }
 0x236   : > { %p424_p6 = scmp.ne.s32.totalorder %s584_s18, %s423_s26  ;;  %p428_p10 = scmp.lt.u32.totalorder %s584_s18, %s631_s2 }
 0x237   : > { %p429_p11 = scmp.lt.u32.totalorder %s427_s29, %s423_s26  ;;  %p431_p13 = scmp.lt.u32.totalorder %s423_s26, %s584_s18 }
 0x238   : > { %p425_p7 = pnand %p424_p6, %p547_p4 }
 0x239   : > { %p430_p12 = por %p429_p11, %p428_p10 }
 0x23a   : > { %p426_p9 = pneg %p425_p7 }
 0x23b   : > { %p432_p0 = por %p431_p13, %p430_p12 }
 0x23d   : > { %p433_p1 = pnand %p432_p0, %p426_p9 }
 0x23f   : > { %436 = shalt.err (!%p433_p1)
}
 0x240   : > { %347 = dma.vmem_to_hbm [thread:$0]  (%p547_p4), %s579_s6, 128, %s584_s18, %s241_s20  }
 0x241 PF: > { %p353_p2 = scmp.ge.s32.totalorder %s487_s14, 2  ;;  %s266_s4 = sand.u32 1, %s467_s9  }
 0x242   : > { %s267_s5 = scalar_lea.sflag [#allocation4], %s266_s4 }
 0x243   : > { %p350_p3 = pnand %p353_p2, %p554_p8 }
 0x245   : > { %462 = dma.done.wait (!%p350_p3), %s267_s5, 128  }
 0x246   : > { %464 = vsyncadd (!%p350_p3), %s267_s5, 4294967168  ;;  %s15_s14 = sadd.s32 1, %s487_s14   ;;  %s634_s9 = smov %s471_s10 }
 0x247   : > { %p12_p5 = scmp.ge.s32.totalorder %s15_s14, 4   ;;  %s635_s10 = smov %s475_s11 }
 0x248   : > { %s636_s11 = smov %s560_s22  ;;  %s637_s12 = smov %s483_s13 }
 0x249   : > { %s638_s13 = smov %s640_s17  ;;  %14 = sbr.rel (!%p12_p5) target bundleno = 4 (0x4), region = 74 }
 0x250   :  { %272 = vsyncpa [#allocation4], 1 }
 0x251   :  { %274 = vsyncpa [#allocation4 + $0x1], 1 }

</bundles_post_ra>
